<compile_context>
chip_gen: v7x
topology: tpu7x:2x2x1
jax: 0.10.0
libtpu: 0.0.40
codegen_flags: <defaults>
</compile_context>

<pallas_src>
import jax
import jax.numpy as jnp
import numpy as np
from jax.experimental import pallas as pl
from jax.experimental.pallas import tpu as pltpu


def _round_up(x, m):
    return ((x + m - 1) // m) * m


def _attention_kernel(enc_ref, hproj_ref, we_ref, v_ref, o_ref):
    # enc_ref  : (E2_p, bb*S)   encoder features, feature-major, columns grouped by batch
    # hproj_ref: (Ddec_p, bb*S) per-column (h @ Wh^T + bias), broadcast per batch
    # we_ref   : (Ddec_p, E2_p) encoder half of the energy Linear weight (zero padded)
    # v_ref    : (Ddec_p, 1)    v weight column (zero padded)
    # o_ref    : (bb, S)        per-batch softmax over S (lane-major rows)
    bb, S = o_ref.shape

    # One fat MXU matmul for the whole batch block: M=Ddec_p, K=E2_p, N=bb*S.
    # (For MXU-bound shapes on v6e/v7x, cast we/enc to bf16 here and keep the
    #  f32 accumulation via preferred_element_type.)
    proj = jnp.dot(we_ref[...], enc_ref[...],
                   preferred_element_type=jnp.float32)          # (Ddec_p, bb*S)

    energy = jnp.tanh(proj + hproj_ref[...])                     # (Ddec_p, bb*S)

    # v projection as VPU multiply + sublane reduce (no N=1 MXU matmul).
    scores = jnp.sum(energy * v_ref[...], axis=0, keepdims=True)  # (1, bb*S)

    # Per-batch softmax over that batch's S columns.  Each row is a lane-major
    # (1, S) slab and is stored with no transpose.  bb is a compile-time
    # constant, so this loop is statically unrolled.
    for b in range(bb):
        row = scores[:, b * S:(b + 1) * S]                       # (1, S) static slice
        m = jnp.max(row, axis=-1, keepdims=True)
        e = jnp.exp(row - m)
        soft = e / jnp.sum(e, axis=-1, keepdims=True)            # (1, S)
        o_ref[pl.ds(b, 1), :] = soft.astype(o_ref.dtype)


def prepare_encoder(encoder_outputs, e2_pad=None):
    """Decoder-independent prep (hoist out of the per-decode-step path).

    (S, B, E2) -> zero-padded (E2_p, B*S), column c = b*S + s holds enc[s, b, :].
    In an autoregressive decode loop, call this once per sequence and pass the
    result to attention_forward(..., enc_prepared=...).
    """
    S, B, E2 = encoder_outputs.shape
    e2p = e2_pad if e2_pad is not None else _round_up(E2, 128)
    enc_fm = jnp.transpose(encoder_outputs, (2, 1, 0)).reshape(E2, B * S)
    return jnp.pad(enc_fm, ((0, e2p - E2), (0, 0)))


def _pick_batch_block(B, S, e2p, ddecp, budget_bytes=8 << 20, max_unroll=64):
    """Choose bb = batches per grid step (fat matmul N = bb*S).

    bb must divide B; a sub-full block additionally needs 128-aligned lane
    width (bb*S) and 8-aligned rows (bb) so the BlockSpec tiles legally.
    Splitting (grid > 1, 'parallel') also lets v7x shard batches over its 2 TCs.
    """
    legal = [bb for bb in range(B, 0, -1)
             if B % bb == 0 and (bb == B or (bb % 8 == 0 and (bb * S) % 128 == 0))]
    for bb in legal:
        if bb <= max_unroll and 4 * bb * S * (e2p + ddecp) <= budget_bytes:
            return bb
    return legal[-1]


def attention_forward(prev_dec_hidden, encoder_outputs, w_energy, b_energy, v_w,
                      *, enc_prepared=None, batch_block=None):
    """
    prev_dec_hidden : [B, Ddec]
    encoder_outputs : [S, B, 2*Denc]            (PyTorch layout)
    w_energy        : [Ddec, Ddec + 2*Denc]     (nn.Linear weight, features = [hidden | encoder])
    b_energy        : [Ddec]
    v_w             : [1, Ddec]                 (nn.Linear weight, no bias)
    returns         : [B, S]
    """
    S, B, E2 = encoder_outputs.shape
    Ddec = prev_dec_hidden.shape[1]

    e2p = _round_up(E2, 128)    # lane / MXU-K axis -> 128-align (zero pad, exact)
    ddecp = _round_up(Ddec, 8)  # sublane / MXU-M axis -> 8-align is sufficient here

    # Decoder-independent HBM relayout (hoistable across decode steps).
    enc_fm = prepare_encoder(encoder_outputs, e2p) if enc_prepared is None else enc_prepared

    # Split the concat-Linear weight exactly: cat([hidden, enc]) @ W^T
    #   == hidden @ Wh^T + enc @ We^T.  The tiny decoder-side projection
    # (h @ Wh^T + bias) is done once here, so Wh never enters the kernel.
    wh = w_energy[:, :Ddec]                                         # (Ddec, Ddec)
    we = w_energy[:, Ddec:]                                         # (Ddec, E2)
    h_proj = jnp.dot(prev_dec_hidden, wh.T,
                     precision=jax.lax.Precision.HIGHEST) + b_energy  # (B, Ddec)
    h_proj = jnp.pad(h_proj, ((0, 0), (0, ddecp - Ddec)))           # (B, Ddec_p)
    hproj_cols = jnp.repeat(h_proj.T, S, axis=1)                    # (Ddec_p, B*S)

    we_p = jnp.pad(we, ((0, ddecp - Ddec), (0, e2p - E2)))          # (Ddec_p, E2_p)
    v_p = jnp.pad(v_w.T, ((0, ddecp - Ddec), (0, 0)))               # (Ddec_p, 1)

    bb = batch_block if batch_block is not None else _pick_batch_block(B, S, e2p, ddecp)
    assert B % bb == 0
    ncols = bb * S
    grid = (B // bb,)

    # Rough VMEM need (double-buffered column blocks + resident weights).
    # Cap at 64 MiB = v7x physical VMEM.
    # TODO(synk): for very long S (or huge bb*S) add a column-tiling grid axis
    # with an online / two-pass softmax instead of one monolithic column block.
    vmem_bytes = 4 * (2 * ncols * (e2p + ddecp) + ddecp * (e2p + 1) + 2 * bb * S)
    vmem_limit = int(min(64 * 2**20, max(32 * 2**20, 2 * vmem_bytes)))

    out = pl.pallas_call(
        _attention_kernel,
        out_shape=jax.ShapeDtypeStruct((B, S), jnp.float32),
        grid_spec=pltpu.PrefetchScalarGridSpec(
            num_scalar_prefetch=0,
            grid=grid,
            in_specs=[
                pl.BlockSpec((e2p, ncols), lambda i: (0, i)),    # encoder columns
                pl.BlockSpec((ddecp, ncols), lambda i: (0, i)),  # h-proj columns
                pl.BlockSpec((ddecp, e2p), lambda i: (0, 0)),    # We (resident)
                pl.BlockSpec((ddecp, 1), lambda i: (0, 0)),      # v  (resident)
            ],
            out_specs=pl.BlockSpec((bb, S), lambda i: (i, 0)),
        ),
        compiler_params=pltpu.CompilerParams(
            dimension_semantics=("parallel",),   # batch blocks are independent (v7x 2 TCs)
            vmem_limit_bytes=vmem_limit),
    )(enc_fm, hproj_cols, we_p, v_p)
    return out


def attention_reference(prev_dec_hidden, encoder_outputs, w_energy, b_energy, v_w):
    """Pure-JAX reference mirroring the PyTorch module exactly."""
    S, B, E2 = encoder_outputs.shape
    hidden = jnp.broadcast_to(prev_dec_hidden[None, :, :],
                              (S, B, prev_dec_hidden.shape[1]))
    cat = jnp.concatenate([hidden, encoder_outputs], axis=-1)      # (S, B, Ddec+E2)
    cat = jnp.transpose(cat, (1, 0, 2))                            # (B, S, Ddec+E2)
    energy = jnp.tanh(cat @ w_energy.T + b_energy)                 # (B, S, Ddec)
    attn = jnp.squeeze(energy @ v_w.T, -1)                         # (B, S)
    return jax.nn.softmax(attn, axis=1)


if __name__ == "__main__":
    # Small shapes consistent with the module's forward.
    B = 2          # batch size
    S = 8          # src phrase length
    Denc = 32      # encoder hidden dim -> encoder-output feature dim = 64
    Ddec = 32      # decoder hidden dim
    E2 = 2 * Denc

    key = jax.random.PRNGKey(0)
    k1, k2, k3, k4, k5 = jax.random.split(key, 5)

    prev_dec_hidden = jax.random.normal(k1, (B, Ddec), dtype=jnp.float32)
    encoder_outputs = jax.random.normal(k2, (S, B, E2), dtype=jnp.float32)

    fan_in_energy = E2 + Ddec
    bound_e = 1.0 / np.sqrt(fan_in_energy)
    w_energy = jax.random.uniform(k3, (Ddec, fan_in_energy), jnp.float32,
                                  minval=-bound_e, maxval=bound_e)
    b_energy = jax.random.uniform(k4, (Ddec,), jnp.float32,
                                  minval=-bound_e, maxval=bound_e)
    bound_v = 1.0 / np.sqrt(Ddec)
    v_w = jax.random.uniform(k5, (1, Ddec), jnp.float32,
                             minval=-bound_v, maxval=bound_v)

    out = attention_forward(prev_dec_hidden, encoder_outputs, w_energy, b_energy, v_w)
    out = jax.block_until_ready(out)

    ref = attention_reference(prev_dec_hidden, encoder_outputs, w_energy, b_energy, v_w)
    np.testing.assert_allclose(np.asarray(out), np.asarray(ref), rtol=1e-5, atol=1e-5)

    assert out.shape == (B, S)
    print("KERNEL_OK")
</pallas_src>

<mosaic_0001>
module attributes {stable_mosaic.version = 11 : i64} {
  func.func @_attention_kernel(%arg0: i32, %arg1: memref<128x16xf32, #tpu.memory_space<vmem>>, %arg2: memref<32x16xf32, #tpu.memory_space<vmem>>, %arg3: memref<32x128xf32, #tpu.memory_space<vmem>>, %arg4: memref<32x1xf32, #tpu.memory_space<vmem>>, %arg5: memref<2x8xf32, #tpu.memory_space<vmem>>) attributes {dimension_semantics = [#tpu.dimension_semantics<parallel>], iteration_bounds = array<i64: 1>, scalar_prefetch = 0 : i64, scratch_operands = 0 : i64, tpu.core_type = #tpu.core_type<tc>, window_params = [{transform_indices = @transform_0, window_bounds = array<i64: 128, 16>}, {transform_indices = @transform_1, window_bounds = array<i64: 32, 16>}, {pipeline_mode = #tpu.pipeline_mode<synchronous>, transform_indices = @transform_2, window_bounds = array<i64: 32, 128>}, {pipeline_mode = #tpu.pipeline_mode<synchronous>, transform_indices = @transform_3, window_bounds = array<i64: 32, 1>}, {transform_indices = @transform_4, window_bounds = array<i64: 2, 8>}]} {
    %c0 = arith.constant 0 : index
    %c0_0 = arith.constant 0 : index
    %0 = vector.load %arg3[%c0, %c0_0] : memref<32x128xf32, #tpu.memory_space<vmem>>, vector<32x128xf32>
    %c0_1 = arith.constant 0 : index
    %c0_2 = arith.constant 0 : index
    %1 = vector.load %arg1[%c0_1, %c0_2] : memref<128x16xf32, #tpu.memory_space<vmem>>, vector<128x16xf32>
    %cst = arith.constant dense<0.000000e+00> : vector<32x16xf32>
    %2 = tpu.matmul %0, %1, %cst {dimension_numbers = #tpu.dot_dimension_numbers<[1], [0], [0], [1], [0, 0, 1, 1], [], []>} : vector<32x128xf32>, vector<128x16xf32>, vector<32x16xf32> -> vector<32x16xf32>
    %c0_3 = arith.constant 0 : index
    %c0_4 = arith.constant 0 : index
    %3 = vector.load %arg2[%c0_3, %c0_4] : memref<32x16xf32, #tpu.memory_space<vmem>>, vector<32x16xf32>
    %4 = arith.addf %2, %3 : vector<32x16xf32>
    %5 = math.tanh %4 : vector<32x16xf32>
    %c0_5 = arith.constant 0 : index
    %c0_6 = arith.constant 0 : index
    %6 = vector.load %arg4[%c0_5, %c0_6] : memref<32x1xf32, #tpu.memory_space<vmem>>, vector<32x1xf32>
    %7 = vector.broadcast %6 : vector<32x1xf32> to vector<32x16xf32>
    %8 = arith.mulf %5, %7 : vector<32x16xf32>
    %cst_7 = arith.constant dense<0.000000e+00> : vector<16xf32>
    %9 = vector.multi_reduction <add>, %8, %cst_7 [0] : vector<32x16xf32> to vector<16xf32>
    %10 = vector.shape_cast %9 : vector<16xf32> to vector<1x16xf32>
    %11 = vector.extract_strided_slice %10 {offsets = [0, 0], sizes = [1, 8], strides = [1, 1]} : vector<1x16xf32> to vector<1x8xf32>
    %cst_8 = arith.constant dense<0xFF800000> : vector<1xf32>
    %12 = vector.multi_reduction <maximumf>, %11, %cst_8 [1] : vector<1x8xf32> to vector<1xf32>
    %13 = vector.shape_cast %12 : vector<1xf32> to vector<1x1xf32>
    %14 = vector.broadcast %13 : vector<1x1xf32> to vector<1x8xf32>
    %15 = arith.subf %11, %14 : vector<1x8xf32>
    %16 = math.exp %15 : vector<1x8xf32>
    %cst_9 = arith.constant dense<0.000000e+00> : vector<1xf32>
    %17 = vector.multi_reduction <add>, %16, %cst_9 [1] : vector<1x8xf32> to vector<1xf32>
    %18 = vector.shape_cast %17 : vector<1xf32> to vector<1x1xf32>
    %19 = vector.broadcast %18 : vector<1x1xf32> to vector<1x8xf32>
    %20 = arith.divf %16, %19 : vector<1x8xf32>
    %c0_10 = arith.constant 0 : index
    %c0_11 = arith.constant 0 : index
    %21 = vector.load %arg5[%c0_10, %c0_11] : memref<2x8xf32, #tpu.memory_space<vmem>>, vector<1x8xf32>
    tpu.vector_store %arg5[%c0_10, %c0_11], %20 {strides = array<i32>} : memref<2x8xf32, #tpu.memory_space<vmem>>, vector<1x8xf32>,
    %22 = vector.extract_strided_slice %10 {offsets = [0, 8], sizes = [1, 8], strides = [1, 1]} : vector<1x16xf32> to vector<1x8xf32>
    %cst_12 = arith.constant dense<0xFF800000> : vector<1xf32>
    %23 = vector.multi_reduction <maximumf>, %22, %cst_12 [1] : vector<1x8xf32> to vector<1xf32>
    %24 = vector.shape_cast %23 : vector<1xf32> to vector<1x1xf32>
    %25 = vector.broadcast %24 : vector<1x1xf32> to vector<1x8xf32>
    %26 = arith.subf %22, %25 : vector<1x8xf32>
    %27 = math.exp %26 : vector<1x8xf32>
    %cst_13 = arith.constant dense<0.000000e+00> : vector<1xf32>
    %28 = vector.multi_reduction <add>, %27, %cst_13 [1] : vector<1x8xf32> to vector<1xf32>
    %29 = vector.shape_cast %28 : vector<1xf32> to vector<1x1xf32>
    %30 = vector.broadcast %29 : vector<1x1xf32> to vector<1x8xf32>
    %31 = arith.divf %27, %30 : vector<1x8xf32>
    %c1 = arith.constant 1 : index
    %c0_14 = arith.constant 0 : index
    %32 = vector.load %arg5[%c1, %c0_14] : memref<2x8xf32, #tpu.memory_space<vmem>>, vector<1x8xf32>
    tpu.vector_store %arg5[%c1, %c0_14], %31 {strides = array<i32>} : memref<2x8xf32, #tpu.memory_space<vmem>>, vector<1x8xf32>,
    return
  }
  func.func @transform_0(%arg0: i32) -> (i32, i32) {
    %c0_i32 = arith.constant 0 : i32
    %c0_i32_0 = arith.constant 0 : i32
    return %c0_i32, %arg0 : i32, i32
  }
  func.func @transform_1(%arg0: i32) -> (i32, i32) {
    %c0_i32 = arith.constant 0 : i32
    %c0_i32_0 = arith.constant 0 : i32
    return %c0_i32, %arg0 : i32, i32
  }
  func.func @transform_2(%arg0: i32) -> (i32, i32) {
    %c0_i32 = arith.constant 0 : i32
    %c0_i32_0 = arith.constant 0 : i32
    %c0_i32_1 = arith.constant 0 : i32
    return %c0_i32, %c0_i32_0 : i32, i32
  }
  func.func @transform_3(%arg0: i32) -> (i32, i32) {
    %c0_i32 = arith.constant 0 : i32
    %c0_i32_0 = arith.constant 0 : i32
    %c0_i32_1 = arith.constant 0 : i32
    return %c0_i32, %c0_i32_0 : i32, i32
  }
  func.func @transform_4(%arg0: i32) -> (i32, i32) {
    %c0_i32 = arith.constant 0 : i32
    %c0_i32_0 = arith.constant 0 : i32
    return %arg0, %c0_i32 : i32, i32
  }
}

</mosaic_0001>

<bundles_post_ra>
// kernel: tpu_custom_call.1
= control target key start
LH: loop header
LB: loop body
LE: loop exit
PB: predicated region body
PF: predicated region fallthrough
CT: control target
= control target key end

     0   :  { %v373_v5 = vmov 0   ;;  %s497_s0 = inlined_call_operand.vmem [shape: f32[128,16], index: 0, kind: input, shape index: {}]   ;;  %s498_s1 = inlined_call_operand.vmem [shape: f32[32,16], index: 1, kind: input, shape index: {}]   ;;  %s499_s2 = inlined_call_operand.vmem [shape: f32[32,128], index: 2, kind: input, shape index: {}]   ;;  %s500_s3 = inlined_call_operand.vmem [shape: f32[32,1], index: 3, kind: input, shape index: {}]   ;;  %s501_s4 = inlined_call_operand.hbm [shape: f32[2,8], index: 4, kind: output, shape index: {}]  }
   0x1   :  { %v22_v0 = vld [vmem:[%s497_s0] sm:$0xff]  ;;  %v23_v1 = vld [vmem:[%s497_s0 + $0x8] sm:$0xff]  ;;  %v24_v2 = vld [vmem:[%s497_s0 + $0x10] sm:$0xff]  ;;  %331 = vset.pattern.permute.xlu0 %v373_v5  ;;  %332 = vset.pattern.permute.xlu1 %v373_v5 }
   0x2   :  { %v280_v3 = vpack.c.bf16 %v23_v1, %v22_v0  ;;  %v25_v4 = vld [vmem:[%s497_s0 + $0x18] sm:$0xff]  ;;  %v26_v7 = vld [vmem:[%s497_s0 + $0x20] sm:$0xff]  ;;  %v27_v8 = vld [vmem:[%s497_s0 + $0x28] sm:$0xff] }
   0x3   :  { %v284_v6 = vpack.c.bf16 %v25_v4, %v24_v2  ;;  %v288_v9 = vpack.c.bf16 %v27_v8, %v26_v7  ;;  %v18_v10 = vld [vmem:[%s499_s2] sm:$0xff]  ;;  %v20_v11 = vld [vmem:[%s499_s2 + $0x10] sm:$0xff]  ;;  %v29_v13 = vld [vmem:[%s497_s0 + $0x38] sm:$0xff] }
   0x4   :  { %281 = vmatprep.subr.bf16.mxu0 %v280_v3  ;;  %312 = vmatprep.subr.bf16.mxu1 %v280_v3  ;;  %v28_v12 = vld [vmem:[%s497_s0 + $0x30] sm:$0xff]  ;;  %v131_v14 = vld [vmem:[%s500_s3] sm:$0xff]  ;;  %v132_v16 = vld [vmem:[%s500_s3 + $0x8] sm:$0xff] }
   0x5   :  { %283 = vmatpush3.bf16.msra.mxu0 %v280_v3  ;;  %320 = vmatpush3.bf16.msra.mxu1 %v280_v3  ;;  %v133_v15 = vld [vmem:[%s500_s3 + $0x10] sm:$0xff] }
   0x6   :  { %285 = vmatprep.subr.bf16.mxu0 %v284_v6  ;;  %313 = vmatprep.subr.bf16.mxu1 %v284_v6 }
   0x7   :  { %274 = vmatprep.mubr.f32.mxu0 %v18_v10  ;;  %277 = vmatprep.mubr.f32.mxu1 %v20_v11 }
   0x8   :  { %137 = vperm.xlu0 %331, %v131_v14  }
   0x9   :  { %287 = vmatpush3.bf16.msra.mxu0 %v284_v6  ;;  %321 = vmatpush3.bf16.msra.mxu1 %v284_v6 }
   0xa   :  { %9 = vsyncpa [#allocation3], 0  ;;  %289 = vmatprep.subr.bf16.mxu0 %v288_v9  ;;  %314 = vmatprep.subr.bf16.mxu1 %v288_v9  ;;  %v292_v17 = vpack.c.bf16 %v29_v13, %v28_v12  ;;  %v30_v18 = vld [vmem:[%s497_s0 + $0x40] sm:$0xff]  ;;  %v31_v19 = vld [vmem:[%s497_s0 + $0x48] sm:$0xff]  ;;  %vm159_vm0 = vcmask 130048   ;;  %vm187_vm1 = vcmask 130112  }
   0xb   :  { %147 = vperm.xlu1 %332, %v133_v15   ;;  %v134_v20 = vld [vmem:[%s500_s3 + $0x18] sm:$0xff]  ;;  %v296_v21 = vpack.c.bf16 %v31_v19, %v30_v18  ;;  %v32_v22 = vld [vmem:[%s497_s0 + $0x50] sm:$0xff]  ;;  %v34_v25 = vld [vmem:[%s497_s0 + $0x60] sm:$0xff]  ;;  %vm173_vm2 = vcmask 64512   ;;  %vm185_vm3 = vcmask 57344  }
   0xc   :  { %142 = vperm.xlu0 %331, %v132_v16   ;;  %v33_v23 = vld [vmem:[%s497_s0 + $0x58] sm:$0xff]  ;;  %v35_v26 = vld [vmem:[%s497_s0 + $0x68] sm:$0xff]  ;;  %v36_v28 = vld [vmem:[%s497_s0 + $0x70] sm:$0xff] }
   0xd   :  { %291 = vmatpush3.bf16.msra.mxu0 %v288_v9  ;;  %322 = vmatpush3.bf16.msra.mxu1 %v288_v9  ;;  %v300_v24 = vpack.c.bf16 %v33_v23, %v32_v22  ;;  %v304_v27 = vpack.c.bf16 %v35_v26, %v34_v25  ;;  %v37_v29 = vld [vmem:[%s497_s0 + $0x78] sm:$0xff]  ;;  %v19_v31 = vld [vmem:[%s499_s2 + $0x8] sm:$0xff]  ;;  %v38_v35 = vld [vmem:[%s498_s1] sm:$0xff] }
   0xe   :  { %293 = vmatprep.subr.bf16.mxu0 %v292_v17  ;;  %315 = vmatprep.subr.bf16.mxu1 %v292_v17  ;;  %v308_v30 = vpack.c.bf16 %v37_v29, %v36_v28  ;;  %v21_v32 = vld [vmem:[%s499_s2 + $0x18] sm:$0xff]  ;;  %v39_v33 = vld [vmem:[%s498_s1 + $0x8] sm:$0xff]  ;;  %v40_v36 = vld [vmem:[%s498_s1 + $0x10] sm:$0xff]  ;;  %s375_s2 = smov [#allocation2]  }
   0xf   :  { %152 = vperm.xlu1 %332, %v134_v20   ;;  %v41_v34 = vld [vmem:[%s498_s1 + $0x18] sm:$0xff]  ;;  %s374_s1 = smov 120   ;;  %s214_s17 = sshll.u32 %s375_s2, 4  ;;  %s215_s17 = int_to_ptr.vmem [resolvable:$true] %s214_s17 }
  0x10   :  { %s349_s18 = scalar_lea.vmem %s215_s17, 32  ;;  %p354_p1 = scmp.lt.s32.totalorder %s215_s17, %s215_s17 }
  0x11   :  { %295 = vmatpush3.bf16.msra.mxu0 %v292_v17  ;;  %323 = vmatpush3.bf16.msra.mxu1 %v292_v17  ;;  %p350_p0 = scmp.ne.s32.totalorder %s215_s17, %s349_s18  ;;  %p355_p2 = scmp.lt.s32.totalorder %s349_s18, %s349_s18 }
  0x12   :  { %297 = vmatprep.subr.bf16.mxu0 %v296_v21  ;;  %316 = vmatprep.subr.bf16.mxu1 %v296_v21 }
  0x13   :  { %p356_p3 = por %p355_p2, %p354_p1 }
  0x15   :  { %299 = vmatpush3.bf16.msra.mxu0 %v296_v21  ;;  %324 = vmatpush3.bf16.msra.mxu1 %v296_v21  ;;  %p357_p4 = pnand %p356_p3, %p350_p0 }
  0x16   :  { %301 = vmatprep.subr.bf16.mxu0 %v300_v24  ;;  %317 = vmatprep.subr.bf16.mxu1 %v300_v24 }
  0x19   :  { %303 = vmatpush3.bf16.msra.mxu0 %v300_v24  ;;  %325 = vmatpush3.bf16.msra.mxu1 %v300_v24 }
  0x1a   :  { %305 = vmatprep.subr.bf16.mxu0 %v304_v27  ;;  %318 = vmatprep.subr.bf16.mxu1 %v304_v27 }
  0x1d   :  { %307 = vmatpush3.bf16.msra.mxu0 %v304_v27  ;;  %326 = vmatpush3.bf16.msra.mxu1 %v304_v27 }
  0x1e   :  { %309 = vmatprep.subr.bf16.mxu0 %v308_v30  ;;  %319 = vmatprep.subr.bf16.mxu1 %v308_v30 }
  0x21   :  { %311 = vmatpush3.bf16.msra.mxu0 %v308_v30  ;;  %327 = vmatpush3.bf16.msra.mxu1 %v308_v30 }
  0x24   :  { %275 = vmatmul.mubr.f32.vlgmr.msra.gmra.mrb[0].mxu0 %v19_v31  ;;  %278 = vmatmul.mubr.f32.vlgmr.msra.gmra.mrb[0].mxu1 %v21_v32 }
  0x87   :  { %v138_v45 = vpop.permute.xlu0 %137 }
  0x8a   :  { %v148_v46 = vpop.permute.xlu1 %147 }
  0x8b   :  { %v143_v48 = vpop.permute.xlu0 %142 }
  0x8e   :  { %v153_v52 = vpop.permute.xlu1 %152 }
  0xf7   :  { %v276_v37 = vpop.f32.mrb[0].mxu0  ;;  %v279_v38 = vpop.f32.mrb[0].mxu1 }
  0xf8   :  { %v114_v39 = vadd.f32 %v276_v37, %v39_v33  ;;  %v124_v40 = vadd.f32 %v279_v38, %v41_v34  ;;  %v108_v41 = vpop.f32.mrb[1].mxu0  ;;  %v118_v42 = vpop.f32.mrb[1].mxu1 }
  0xf9   :  { %v109_v43 = vadd.f32 %v108_v41, %v38_v35  ;;  %v119_v44 = vadd.f32 %v118_v42, %v40_v36 }
  0xfa   :  { %333 = vtanh.f32 %v114_v39 }
  0xfb   :  { %335 = vtanh.f32 %v124_v40 }
  0xfc   :  { %337 = vtanh.f32 %v109_v43 }
  0xfd   :  { %339 = vtanh.f32 %v119_v44 }
 0x104   :  { %v334_v47 = vpop.eup %333 }
 0x105   :  { %v336_v49 = vpop.eup %335  ;;  %v156_v50 = vmul.f32 %v334_v47, %v143_v48 }
 0x106   :  { %v338_v51 = vpop.eup %337  ;;  %v158_v58 = vmul.f32 %v336_v49, %v153_v52 }
 0x107   :  { %v340_v53 = vpop.eup %339  ;;  %v155_v54 = vmul.f32 %v338_v51, %v138_v45  ;;  %v161_v55 = vsel %vm159_vm0, %v156_v50, 0.0 }
 0x108   :  { %v157_v56 = vmul.f32 %v340_v53, %v148_v46  ;;  %v165_v62 = vsel %vm159_vm0, %v158_v58, 0.0 }
 0x109   :  { %v160_v57 = vsel %vm159_vm0, %v155_v54, 0.0 }
 0x10a   :  { %v162_v59 = vadd.f32 %v161_v55, %v160_v57  ;;  %v163_v60 = vsel %vm159_vm0, %v157_v56, 0.0 }
 0x10c   :  { %v164_v61 = vadd.f32 %v163_v60, %v162_v59 }
 0x10e   :  { %v166_v63 = vadd.f32 %v165_v62, %v164_v61 }
 0x110   :  { %v167_v0 = vrot.slane %v166_v63, 4 }
 0x112   :  { %v168_v1 = vadd.f32 %v167_v0, %v166_v63 }
 0x114   :  { %v169_v2 = vrot.slane %v168_v1, 2 }
 0x116   :  { %v170_v3 = vadd.f32 %v169_v2, %v168_v1 }
 0x118   :  { %v171_v4 = vrot.slane %v170_v3, 1 }
 0x11a   :  { %v172_v5 = vadd.f32 %v171_v4, %v170_v3 }
 0x11c   :  { %v188_v6 = vsel %vm187_vm1, %v172_v5, -inf  ;;  %v174_v11 = vsel %vm173_vm2, %v172_v5, -inf }
 0x11d   :  { %189 = vmax.xlane.f32.xlu0 %v188_v6 }
 0x1aa   :  { %v190_v7 = vpop.xlane.xlu0 %189 }
 0x1ab   :  { %v191_v8 = vsub.f32 %v172_v5, %v190_v7 }
 0x1ad   :  { %v192_v9 = vmul.f32 1.442695, %v191_v8 }
 0x1af   :  { %341 = vpow2.f32 %v192_v9 }
 0x1b9   :  { %v342_v10 = vpop.eup %341 }
 0x1ba   :  { %195 = vrot.lane.b32.xlu1 %v342_v10, %s374_s1 }
 0x1de   :  { %175 = vmax.xlane.f32.xlu1 %v174_v11 }
 0x22c   :  { %v196_v12 = vpop.permute.xlu1 %195 }
 0x22d   :  { %v198_v13 = vsel %vm173_vm2, %v196_v12, 0.0 }
 0x22e   :  { %199 = vadd.xlane.f32.xlu0 %v198_v13 }
 0x26b   :  { %v176_v14 = vpop.xlane.xlu1 %175 }
 0x26c   :  { %v177_v15 = vsub.f32 %v172_v5, %v176_v14 }
 0x26e   :  { %v178_v16 = vmul.f32 1.442695, %v177_v15 }
 0x270   :  { %343 = vpow2.f32 %v178_v16 }
 0x27a   :  { %v344_v17 = vpop.eup %343 }
 0x27b   :  { %v180_v18 = vsel %vm173_vm2, %v344_v17, 0.0 }
 0x27c   :  { %181 = vadd.xlane.f32.xlu0 %v180_v18 }
 0x2bb   :  { %v200_v19 = vpop.xlane.xlu0 %199 }
 0x2bc   :  { %345 = vrcp.f32 %v200_v19 }
 0x2c6   :  { %v346_v20 = vpop.eup %345 }
 0x2c7   :  { %v202_v21 = vmul.f32 %v346_v20, %v342_v10 }
 0x2c9   :  { %204 = vrot.lane.b32.xlu0 %v202_v21, %s374_s1 }
 0x309   :  { %v182_v22 = vpop.xlane.xlu0 %181 }
 0x30a   :  { %347 = vrcp.f32 %v182_v22 }
 0x314   :  { %v348_v23 = vpop.eup %347 }
 0x315   :  { %v184_v24 = vmul.f32 %v348_v23, %v344_v17 }
 0x317   :  { %186 = vst.msk [vmem:[#allocation2] sm:$0x1] %vm185_vm3, %v184_v24 }
 0x33b   :  { %v205_v25 = vpop.permute.xlu0 %204 }
 0x33c   :  { %207 = vst.msk [vmem:[#allocation2 + $0x1] sm:$0x1] %vm185_vm3, %v205_v25 }
 0x33d   :  { %360 = shalt.err (!%p357_p4)
}
 0x33e   :  { %s361_s21 = scalar_lea.hbm %s501_s4, 32 }
 0x33f   :  { %p362_p5 = scmp.ne.s32.totalorder %s501_s4, %s361_s21  ;;  %p365_p6 = scmp.lt.u32.totalorder %s361_s21, %s501_s4 }
 0x341   :  { %p367_p7 = pnand %p365_p6, %p362_p5 }
 0x343   :  { %370 = shalt.err (!%p367_p7)
}
 0x344   :  { %217 = dma.vmem_to_hbm [thread:$0]  %s215_s17, 32, %s501_s4, [#allocation3]  }
 0x345   :  { %371 = dma.done.wait [#allocation3], 32  }
 0x346   :  { %372 = vsyncadd [#allocation3], 4294967264 }
 0x347   :  { %221 = vsyncpa [#allocation3], 1 }

</bundles_post_ra>
